<compile_context>
chip_gen: v7x
topology: tpu7x:2x2x1
jax: 0.10.0
libtpu: 0.0.40
codegen_flags: <defaults>
</compile_context>

<pallas_src>
import functools
import math

import jax
import jax.numpy as jnp
from jax.experimental import pallas as pl
from jax.experimental.pallas import tpu as pltpu


def _round_up(x, m):
    return (x + m - 1) // m * m


@functools.lru_cache(maxsize=None)
def _vmem_capacity_bytes():
    """Physical per-core VMEM in bytes, or 0 if it cannot be queried."""
    try:
        info = pltpu.get_tpu_info()
        cap = int(getattr(info, "vmem_capacity_bytes", 0))
        if cap > 0:
            return cap
    except Exception:
        pass
    return 0


def _vmem_limit_bytes():
    cap = _vmem_capacity_bytes()
    if cap <= 0:
        return 64 * 1024 * 1024                       # safe on every generation
    # leave headroom for compiler-internal scratch / double buffers
    return min(cap * 3 // 4, 100 * 1024 * 1024)


def _max_seq_tile():
    # 512-row tiles on 128 MiB VMEM parts (v5e/v6e); 256 otherwise (v7x/unknown)
    return 512 if _vmem_capacity_bytes() >= 96 * 1024 * 1024 else 256


def _choose_seq_tile(n):
    """Pick a sequence tile that minimises padding (attention is O(Np^2))."""
    n8 = _round_up(max(n, 8), 8)
    max_tile = _max_seq_tile()
    if n8 <= max_tile:
        return n8                                     # single tile, no padding
    candidates = [s for s in (512, 384, 256, 192, 128) if s <= max_tile]
    return min(candidates, key=lambda s: (_round_up(n, s), -s))


def _cparams(semantics):
    return pltpu.CompilerParams(dimension_semantics=semantics,
                                vmem_limit_bytes=_vmem_limit_bytes())


def _resident_vmem_spec():
    # Whole array kept resident in VMEM (constant across the grid); no
    # per-step re-streaming of weights / biases / LayerNorm params.
    return pl.BlockSpec(memory_space=pltpu.MemorySpace.VMEM)


def _layer_norm(y, gamma, beta):
    mu = jnp.mean(y, axis=-1, keepdims=True)
    var = jnp.mean((y - mu) ** 2, axis=-1, keepdims=True)
    return (y - mu) * jax.lax.rsqrt(var + 1e-5) * gamma + beta


# ----------------------------------------------------------------------------
# Kernel A: input projection + positional encoding + QKV projection of layer 0
# ----------------------------------------------------------------------------
def _embed_qkv_kernel(x_ref, w_ref, b_ref, pe_ref, wqkv_ref, bqkv_ref,
                      h_ref, q_ref, k_ref, v_ref, *, d_model):
    # x: (1, S, Din_p) bf16, w: (Din_p, D) bf16, b: (1, D) f32, pe: (S, D) f32
    h = jnp.dot(x_ref[0], w_ref[...], preferred_element_type=jnp.float32)
    h = h + b_ref[...] + pe_ref[...]
    h_ref[0] = h.astype(h_ref.dtype)
    qkv = jnp.dot(h.astype(jnp.bfloat16), wqkv_ref[...],
                  preferred_element_type=jnp.float32) + bqkv_ref[...]
    q_ref[0] = qkv[:, 0 * d_model:1 * d_model].astype(q_ref.dtype)
    k_ref[0] = qkv[:, 1 * d_model:2 * d_model].astype(k_ref.dtype)
    v_ref[0] = qkv[:, 2 * d_model:3 * d_model].astype(v_ref.dtype)


def embed_and_qkv(x, w, b, pe, wqkv, bqkv, seq_tile):
    B, Np, din = x.shape
    D = w.shape[1]
    S = seq_tile
    nt = Np // S
    h_out = jax.ShapeDtypeStruct((B, Np, D), jnp.float32)
    qkv_out = jax.ShapeDtypeStruct((B, Np, D), jnp.bfloat16)
    flops = 2 * B * Np * din * D + 6 * B * Np * D * D
    bytes_accessed = int(x.size * 2 + (w.size + wqkv.size) * 2 + pe.size * 4
                         + B * Np * D * 4 + 3 * B * Np * D * 2)
    kernel = functools.partial(_embed_qkv_kernel, d_model=D)
    row_block = pl.BlockSpec((1, S, D), lambda bi, si: (bi, si, 0))
    return pl.pallas_call(
        kernel,
        out_shape=(h_out, qkv_out, qkv_out, qkv_out),
        grid=(B, nt),
        in_specs=[
            pl.BlockSpec((1, S, din), lambda bi, si: (bi, si, 0)),   # x
            _resident_vmem_spec(),                                   # w_in
            _resident_vmem_spec(),                                   # b_in
            pl.BlockSpec((S, D), lambda bi, si: (si, 0)),            # pe
            _resident_vmem_spec(),                                   # wqkv (L0)
            _resident_vmem_spec(),                                   # bqkv (L0)
        ],
        out_specs=(row_block, row_block, row_block, row_block),
        compiler_params=_cparams(("parallel", "parallel")),
        cost_estimate=pl.CostEstimate(flops=flops, transcendentals=0,
                                      bytes_accessed=bytes_accessed),
    )(x, w, b, pe, wqkv, bqkv)


# ----------------------------------------------------------------------------
# Kernel B: fused encoder layer
#   flash attention (online softmax over kv tiles) + per-head output
#   projection + residual + LN1 + FFN + residual + LN2 (+ next-layer QKV)
# ----------------------------------------------------------------------------
def _encoder_layer_kernel(*refs, num_heads, true_len, kv_tile, needs_mask,
                          emit_qkv, approx_recip):
    if emit_qkv:
        (q_ref, k_ref, v_ref, x_ref,
         wo_ref, bo_ref, g1_ref, be1_ref,
         w1_ref, fb1_ref, w2_ref, fb2_ref, g2_ref, be2_ref,
         wqkv_ref, bqkv_ref,
         o_ref, qn_ref, kn_ref, vn_ref,
         m_scr, l_scr, acc_scr) = refs
    else:
        (q_ref, k_ref, v_ref, x_ref,
         wo_ref, bo_ref, g1_ref, be1_ref,
         w1_ref, fb1_ref, w2_ref, fb2_ref, g2_ref, be2_ref,
         o_ref,
         m_scr, l_scr, acc_scr) = refs

    ki = pl.program_id(2)

    @pl.when(ki == 0)
    def _():
        m_scr[...] = jnp.full_like(m_scr, -1e30)
        l_scr[...] = jnp.zeros_like(l_scr)
        acc_scr[...] = jnp.zeros_like(acc_scr)

    S, D = q_ref.shape[1], q_ref.shape[2]
    hd = D // num_heads
    scale = hd ** -0.5

    q = q_ref[0].reshape(S, num_heads, hd)            # bf16
    k = k_ref[0].reshape(kv_tile, num_heads, hd)      # bf16
    v = v_ref[0].reshape(kv_tile, num_heads, hd)      # bf16

    # head-batched MXU matmul: s[h, i, j] = sum_d q[i,h,d] * k[j,h,d]
    s = jnp.einsum("qhd,khd->hqk", q, k,
                   preferred_element_type=jnp.float32) * scale      # (H, S, Tk)
    if needs_mask:
        key_pos = ki * kv_tile + jax.lax.broadcasted_iota(jnp.int32, s.shape, 2)
        s = jnp.where(key_pos < true_len, s, -1e30)

    m_prev = m_scr[...]                                             # (H, S, 1)
    m_new = jnp.maximum(m_prev, jnp.max(s, axis=-1, keepdims=True))
    alpha = jnp.exp(m_prev - m_new)
    p = jnp.exp(s - m_new)
    l_scr[...] = alpha * l_scr[...] + jnp.sum(p, axis=-1, keepdims=True)
    pv = jnp.einsum("hqk,khd->hqd", p.astype(v.dtype), v,
                    preferred_element_type=jnp.float32)             # (H, S, hd)
    acc_scr[...] = alpha * acc_scr[...] + pv
    m_scr[...] = m_new

    @pl.when(ki == pl.num_programs(2) - 1)
    def _():
        if approx_recip:
            inv_l = pl.reciprocal(l_scr[...], approx=True)          # EUP path
        else:
            inv_l = 1.0 / l_scr[...]
        attn = acc_scr[...] * inv_l                                 # (H, S, hd)

        # Per-head output projection: avoids the (H,S,hd)->(S,D) transpose /
        # reshape of the accumulator; each head's slab stays contiguous.
        wo = wo_ref[...]                                            # (D, D)
        y = bo_ref[...]                                             # (1, D)
        for hi in range(num_heads):
            y = y + jnp.dot(attn[hi].astype(jnp.bfloat16),
                            wo[hi * hd:(hi + 1) * hd, :],
                            preferred_element_type=jnp.float32)

        h1 = _layer_norm(x_ref[0] + y, g1_ref[...], be1_ref[...])   # (S, D) f32

        # FFN: D -> 4D -> ReLU -> D, residual, LayerNorm2
        mid = jnp.dot(h1.astype(jnp.bfloat16), w1_ref[...],
                      preferred_element_type=jnp.float32) + fb1_ref[...]
        mid = jnp.maximum(mid, 0.0)
        y2 = jnp.dot(mid.astype(jnp.bfloat16), w2_ref[...],
                     preferred_element_type=jnp.float32) + fb2_ref[...]
        h2 = _layer_norm(h1 + y2, g2_ref[...], be2_ref[...])
        o_ref[0] = h2.astype(o_ref.dtype)

        if emit_qkv:
            # Fold the next layer's QKV projection into this epilogue while
            # h2 is still resident in VMEM.
            qkv = jnp.dot(h2.astype(jnp.bfloat16), wqkv_ref[...],
                          preferred_element_type=jnp.float32) + bqkv_ref[...]
            qn_ref[0] = qkv[:, 0 * D:1 * D].astype(qn_ref.dtype)
            kn_ref[0] = qkv[:, 1 * D:2 * D].astype(kn_ref.dtype)
            vn_ref[0] = qkv[:, 2 * D:3 * D].astype(vn_ref.dtype)


def encoder_layer(h, q, k, v, layer, num_heads, true_len, seq_tile,
                  next_qkv=None, approx_recip=True):
    (_, _, wo, bo, g1, be1, w1, fb1, w2, fb2, g2, be2) = layer
    B, Np, D = h.shape
    S = seq_tile
    nq = Np // S
    nk = Np // S
    hd = D // num_heads
    emit_qkv = next_qkv is not None

    kernel = functools.partial(
        _encoder_layer_kernel, num_heads=num_heads, true_len=true_len,
        kv_tile=S, needs_mask=(Np != true_len), emit_qkv=emit_qkv,
        approx_recip=approx_recip)

    q_block = pl.BlockSpec((1, S, D), lambda bi, qi, ki: (bi, qi, 0))
    kv_block = pl.BlockSpec((1, S, D), lambda bi, qi, ki: (bi, ki, 0))
    n_resident = 12 if emit_qkv else 10
    in_specs = ([q_block, kv_block, kv_block, q_block]
                + [_resident_vmem_spec() for _ in range(n_resident)])

    h_out = jax.ShapeDtypeStruct((B, Np, D), jnp.float32)
    out_block = pl.BlockSpec((1, S, D), lambda bi, qi, ki: (bi, qi, 0))
    if emit_qkv:
        qkv_sd = jax.ShapeDtypeStruct((B, Np, D), jnp.bfloat16)
        out_shape = (h_out, qkv_sd, qkv_sd, qkv_sd)
        out_specs = (out_block, out_block, out_block, out_block)
    else:
        out_shape = h_out
        out_specs = out_block

    flops = (4 * B * Np * Np * D             # QK^T + PV
             + 2 * B * Np * D * D            # output projection
             + 16 * B * Np * D * D           # FFN (D -> 4D -> D)
             + (6 * B * Np * D * D if emit_qkv else 0))
    transcendentals = B * num_heads * Np * Np
    weight_bytes = (wo.size + w1.size + w2.size) * 2
    if emit_qkv:
        weight_bytes += next_qkv[0].size * 2
    bytes_accessed = int(
        B * Np * D * 2                       # q
        + 2 * nq * B * Np * D * 2            # k, v re-read once per query tile
        + 2 * B * Np * D * 4                 # residual in + h out
        + (3 * B * Np * D * 2 if emit_qkv else 0)
        + weight_bytes)

    operands = [q, k, v, h, wo, bo, g1, be1, w1, fb1, w2, fb2, g2, be2]
    if emit_qkv:
        operands += [next_qkv[0], next_qkv[1]]

    return pl.pallas_call(
        kernel,
        out_shape=out_shape,
        grid=(B, nq, nk),
        in_specs=in_specs,
        out_specs=out_specs,
        scratch_shapes=[
            pltpu.VMEM((num_heads, S, 1), jnp.float32),   # running max
            pltpu.VMEM((num_heads, S, 1), jnp.float32),   # running sum
            pltpu.VMEM((num_heads, S, hd), jnp.float32),  # running output
        ],
        compiler_params=_cparams(("parallel", "parallel", "arbitrary")),
        cost_estimate=pl.CostEstimate(flops=flops,
                                      transcendentals=transcendentals,
                                      bytes_accessed=bytes_accessed),
    )(*operands)


# ----------------------------------------------------------------------------
# Parameters (f32, PyTorch-equivalent layout) and kernel-format preparation
# ----------------------------------------------------------------------------
def make_positional_encoding(seq_len, d_model):
    position = jnp.arange(seq_len, dtype=jnp.float32)[:, None]
    div_term = jnp.exp(jnp.arange(0, d_model, 2, dtype=jnp.float32)
                       * (-math.log(10000.0) / d_model))
    pe = jnp.zeros((seq_len, d_model), dtype=jnp.float32)
    pe = pe.at[:, 0::2].set(jnp.sin(position * div_term))
    pe = pe.at[:, 1::2].set(jnp.cos(position * div_term))
    return pe


def init_params(key, input_dim, d_model, num_layers):
    def linear(k, fan_in, fan_out):
        k1, k2 = jax.random.split(k)
        bound = 1.0 / math.sqrt(fan_in)
        w = jax.random.uniform(k1, (fan_in, fan_out), jnp.float32, -bound, bound)
        b = jax.random.uniform(k2, (fan_out,), jnp.float32, -bound, bound)
        return w, b

    keys = jax.random.split(key, 1 + num_layers)
    proj_w, proj_b = linear(keys[0], input_dim, d_model)

    layers = []
    for li in range(num_layers):
        lk = jax.random.split(keys[1 + li], 4)
        qkv_w, qkv_b = linear(lk[0], d_model, 3 * d_model)
        out_w, out_b = linear(lk[1], d_model, d_model)
        fc1_w, fc1_b = linear(lk[2], d_model, 4 * d_model)
        fc2_w, fc2_b = linear(lk[3], 4 * d_model, d_model)
        ln1_g = jnp.ones((d_model,), jnp.float32)
        ln1_b = jnp.zeros((d_model,), jnp.float32)
        ln2_g = jnp.ones((d_model,), jnp.float32)
        ln2_b = jnp.zeros((d_model,), jnp.float32)
        layers.append((qkv_w, qkv_b, out_w, out_b,
                       ln1_g, ln1_b,
                       fc1_w, fc1_b, fc2_w, fc2_b,
                       ln2_g, ln2_b))
    return (proj_w, proj_b), layers


def prepare_kernel_params(proj, layers):
    """bf16 weights, (1, D)-shaped f32 biases / LN params, padded input_dim."""
    proj_w, proj_b = proj
    din = proj_w.shape[0]
    din_p = _round_up(din, 8)
    kproj = (jnp.pad(proj_w, ((0, din_p - din), (0, 0))).astype(jnp.bfloat16),
             proj_b.reshape(1, -1).astype(jnp.float32))
    klayers = []
    for (qkv_w, qkv_b, out_w, out_b, g1, b1,
         fc1_w, fc1_b, fc2_w, fc2_b, g2, b2) in layers:
        klayers.append((
            qkv_w.astype(jnp.bfloat16), qkv_b.reshape(1, -1),
            out_w.astype(jnp.bfloat16), out_b.reshape(1, -1),
            g1.reshape(1, -1), b1.reshape(1, -1),
            fc1_w.astype(jnp.bfloat16), fc1_b.reshape(1, -1),
            fc2_w.astype(jnp.bfloat16), fc2_b.reshape(1, -1),
            g2.reshape(1, -1), b2.reshape(1, -1),
        ))
    return kproj, klayers


# ----------------------------------------------------------------------------
# Full forward pass (Pallas kernels)
# ----------------------------------------------------------------------------
def informer_forward(x, kproj, pe, klayers, num_heads, seq_tile=None,
                     approx_recip=True):
    proj_w, proj_b = kproj
    B, N, din = x.shape
    din_p, D = proj_w.shape
    assert D % num_heads == 0
    assert len(klayers) >= 1, "need at least one encoder layer"

    S = _choose_seq_tile(N) if seq_tile is None else seq_tile
    Np = _round_up(N, S)
    # Every kv tile must contain at least one un-padded key so the -1e30 mask
    # / m_scr sentinel never sees a fully-masked softmax row.
    assert Np - N < S

    x_p = jnp.pad(x, ((0, 0), (0, Np - N), (0, din_p - din))).astype(jnp.bfloat16)
    pe_p = jnp.pad(pe.astype(jnp.float32), ((0, Np - pe.shape[0]), (0, 0)))

    # Layer 0 QKV is folded into the embedding kernel.
    h, q, k, v = embed_and_qkv(x_p, proj_w, proj_b, pe_p,
                               klayers[0][0], klayers[0][1], S)

    n_layers = len(klayers)
    for li, layer in enumerate(klayers):
        if li + 1 < n_layers:
            next_qkv = (klayers[li + 1][0], klayers[li + 1][1])
            h, q, k, v = encoder_layer(h, q, k, v, layer, num_heads, N, S,
                                       next_qkv=next_qkv,
                                       approx_recip=approx_recip)
        else:
            h = encoder_layer(h, q, k, v, layer, num_heads, N, S,
                              approx_recip=approx_recip)
    return h[:, :N, :]


# ----------------------------------------------------------------------------
# Pure-JAX reference (bf16 matmul operands, f32 accumulation — same numerics
# policy as the kernels; softmax / LayerNorm in f32).
# ----------------------------------------------------------------------------
def _mm(a, b):
    return jnp.dot(a.astype(jnp.bfloat16), b.astype(jnp.bfloat16),
                   preferred_element_type=jnp.float32)


def informer_reference(x, proj, pe, layers, num_heads):
    proj_w, proj_b = proj
    h = _mm(x, proj_w) + proj_b + pe[None]
    B, N, D = h.shape
    hd = D // num_heads
    scale = hd ** (-0.5)

    def ln(y, g, b):
        mu = jnp.mean(y, axis=-1, keepdims=True)
        var = jnp.mean((y - mu) ** 2, axis=-1, keepdims=True)
        return (y - mu) / jnp.sqrt(var + 1e-5) * g + b

    for (qkv_w, qkv_b, out_w, out_b, g1, b1,
         fc1_w, fc1_b, fc2_w, fc2_b, g2, b2) in layers:
        qkv = _mm(h, qkv_w) + qkv_b
        q = qkv[..., :D].reshape(B, N, num_heads, hd)
        k = qkv[..., D:2 * D].reshape(B, N, num_heads, hd)
        v = qkv[..., 2 * D:].reshape(B, N, num_heads, hd)
        s = jnp.einsum("bqhd,bkhd->bhqk",
                       q.astype(jnp.bfloat16), k.astype(jnp.bfloat16),
                       preferred_element_type=jnp.float32) * scale
        p = jax.nn.softmax(s, axis=-1)
        a = jnp.einsum("bhqk,bkhd->bqhd",
                       p.astype(jnp.bfloat16), v.astype(jnp.bfloat16),
                       preferred_element_type=jnp.float32).reshape(B, N, D)
        a = _mm(a, out_w) + out_b
        h1 = ln(h + a, g1, b1)
        f = _mm(jnp.maximum(_mm(h1, fc1_w) + fc1_b, 0.0), fc2_w) + fc2_b
        h = ln(h1 + f, g2, b2)
    return h


if __name__ == "__main__":
    # Small shapes consistent with the module.
    B, seq_len, input_dim = 2, 8, 4
    d_model, num_heads, num_layers = 32, 4, 2

    key = jax.random.PRNGKey(0)
    kx, kp = jax.random.split(key)
    x = jax.random.normal(kx, (B, seq_len, input_dim), dtype=jnp.float32)

    proj, layers = init_params(kp, input_dim, d_model, num_layers)
    pe = make_positional_encoding(seq_len, d_model)
    kproj, klayers = prepare_kernel_params(proj, layers)

    out = informer_forward(x, kproj, pe, klayers, num_heads)
    out = jax.block_until_ready(out)
    assert out.shape == (B, seq_len, d_model)

    ref = informer_reference(x, proj, pe, layers, num_heads)
    max_err = float(jnp.max(jnp.abs(out - ref)))
    if max_err > 5e-2:
        raise AssertionError(f"Pallas/ref mismatch: max abs err {max_err}")

    print("KERNEL_OK")
</pallas_src>

<mosaic_0001>
module attributes {stable_mosaic.version = 11 : i64} {
  func.func @_embed_qkv_kernel(%arg0: i32, %arg1: i32, %arg2: memref<1x8x8xbf16, #tpu.memory_space<vmem>>, %arg3: memref<8x32xbf16, #tpu.memory_space<vmem>>, %arg4: memref<1x32xf32, #tpu.memory_space<vmem>>, %arg5: memref<8x32xf32, #tpu.memory_space<vmem>>, %arg6: memref<32x96xbf16, #tpu.memory_space<vmem>>, %arg7: memref<1x96xf32, #tpu.memory_space<vmem>>, %arg8: memref<1x8x32xf32, #tpu.memory_space<vmem>>, %arg9: memref<1x8x32xbf16, #tpu.memory_space<vmem>>, %arg10: memref<1x8x32xbf16, #tpu.memory_space<vmem>>, %arg11: memref<1x8x32xbf16, #tpu.memory_space<vmem>>) attributes {dimension_semantics = [#tpu.dimension_semantics<parallel>, #tpu.dimension_semantics<parallel>], iteration_bounds = array<i64: 2, 1>, scalar_prefetch = 0 : i64, scratch_operands = 0 : i64, tpu.core_type = #tpu.core_type<tc>, window_params = [{transform_indices = @transform_0, window_bounds = array<i64: 1, 8, 8>}, {pipeline_mode = #tpu.pipeline_mode<synchronous>, transform_indices = @transform_1, window_bounds = array<i64: 8, 32>}, {pipeline_mode = #tpu.pipeline_mode<synchronous>, transform_indices = @transform_2, window_bounds = array<i64: 1, 32>}, {transform_indices = @transform_3, window_bounds = array<i64: 8, 32>}, {pipeline_mode = #tpu.pipeline_mode<synchronous>, transform_indices = @transform_4, window_bounds = array<i64: 32, 96>}, {pipeline_mode = #tpu.pipeline_mode<synchronous>, transform_indices = @transform_5, window_bounds = array<i64: 1, 96>}, {transform_indices = @transform_6, window_bounds = array<i64: 1, 8, 32>}, {transform_indices = @transform_7, window_bounds = array<i64: 1, 8, 32>}, {transform_indices = @transform_8, window_bounds = array<i64: 1, 8, 32>}, {transform_indices = @transform_9, window_bounds = array<i64: 1, 8, 32>}]} {
    %c0 = arith.constant 0 : index
    %c0_0 = arith.constant 0 : index
    %c0_1 = arith.constant 0 : index
    %0 = vector.load %arg2[%c0, %c0_0, %c0_1] : memref<1x8x8xbf16, #tpu.memory_space<vmem>>, vector<1x8x8xbf16>
    %1 = vector.shape_cast %0 : vector<1x8x8xbf16> to vector<8x8xbf16>
    %c0_2 = arith.constant 0 : index
    %c0_3 = arith.constant 0 : index
    %2 = vector.load %arg3[%c0_2, %c0_3] : memref<8x32xbf16, #tpu.memory_space<vmem>>, vector<8x32xbf16>
    %cst = arith.constant dense<0.000000e+00> : vector<8x32xf32>
    %3 = tpu.matmul %1, %2, %cst {dimension_numbers = #tpu.dot_dimension_numbers<[1], [0], [0], [1], [0, 0, 1, 1], [], []>} : vector<8x8xbf16>, vector<8x32xbf16>, vector<8x32xf32> -> vector<8x32xf32>
    %c0_4 = arith.constant 0 : index
    %c0_5 = arith.constant 0 : index
    %4 = vector.load %arg4[%c0_4, %c0_5] : memref<1x32xf32, #tpu.memory_space<vmem>>, vector<1x32xf32>
    %5 = vector.broadcast %4 : vector<1x32xf32> to vector<8x32xf32>
    %6 = arith.addf %3, %5 : vector<8x32xf32>
    %c0_6 = arith.constant 0 : index
    %c0_7 = arith.constant 0 : index
    %7 = vector.load %arg5[%c0_6, %c0_7] : memref<8x32xf32, #tpu.memory_space<vmem>>, vector<8x32xf32>
    %8 = arith.addf %6, %7 : vector<8x32xf32>
    %c0_8 = arith.constant 0 : index
    %c0_9 = arith.constant 0 : index
    %c0_10 = arith.constant 0 : index
    %9 = vector.load %arg8[%c0_8, %c0_9, %c0_10] : memref<1x8x32xf32, #tpu.memory_space<vmem>>, vector<1x8x32xf32>
    %10 = vector.shape_cast %9 : vector<1x8x32xf32> to vector<8x32xf32>
    %11 = vector.shape_cast %8 : vector<8x32xf32> to vector<1x8x32xf32>
    tpu.vector_store %arg8[%c0_8, %c0_9, %c0_10], %11 {strides = array<i32>} : memref<1x8x32xf32, #tpu.memory_space<vmem>>, vector<1x8x32xf32>,
    %12 = arith.truncf %8 : vector<8x32xf32> to vector<8x32xbf16>
    %c0_11 = arith.constant 0 : index
    %c0_12 = arith.constant 0 : index
    %13 = vector.load %arg6[%c0_11, %c0_12] : memref<32x96xbf16, #tpu.memory_space<vmem>>, vector<32x96xbf16>
    %cst_13 = arith.constant dense<0.000000e+00> : vector<8x96xf32>
    %14 = tpu.matmul %12, %13, %cst_13 {dimension_numbers = #tpu.dot_dimension_numbers<[1], [0], [0], [1], [0, 0, 1, 1], [], []>} : vector<8x32xbf16>, vector<32x96xbf16>, vector<8x96xf32> -> vector<8x96xf32>
    %c0_14 = arith.constant 0 : index
    %c0_15 = arith.constant 0 : index
    %15 = vector.load %arg7[%c0_14, %c0_15] : memref<1x96xf32, #tpu.memory_space<vmem>>, vector<1x96xf32>
    %16 = vector.broadcast %15 : vector<1x96xf32> to vector<8x96xf32>
    %17 = arith.addf %14, %16 : vector<8x96xf32>
    %18 = vector.extract_strided_slice %17 {offsets = [0, 0], sizes = [8, 32], strides = [1, 1]} : vector<8x96xf32> to vector<8x32xf32>
    %19 = arith.truncf %18 : vector<8x32xf32> to vector<8x32xbf16>
    %c0_16 = arith.constant 0 : index
    %c0_17 = arith.constant 0 : index
    %c0_18 = arith.constant 0 : index
    %20 = vector.load %arg9[%c0_16, %c0_17, %c0_18] : memref<1x8x32xbf16, #tpu.memory_space<vmem>>, vector<1x8x32xbf16>
    %21 = vector.shape_cast %20 : vector<1x8x32xbf16> to vector<8x32xbf16>
    %22 = vector.shape_cast %19 : vector<8x32xbf16> to vector<1x8x32xbf16>
    tpu.vector_store %arg9[%c0_16, %c0_17, %c0_18], %22 {strides = array<i32>} : memref<1x8x32xbf16, #tpu.memory_space<vmem>>, vector<1x8x32xbf16>,
    %23 = vector.extract_strided_slice %17 {offsets = [0, 32], sizes = [8, 32], strides = [1, 1]} : vector<8x96xf32> to vector<8x32xf32>
    %24 = arith.truncf %23 : vector<8x32xf32> to vector<8x32xbf16>
    %c0_19 = arith.constant 0 : index
    %c0_20 = arith.constant 0 : index
    %c0_21 = arith.constant 0 : index
    %25 = vector.load %arg10[%c0_19, %c0_20, %c0_21] : memref<1x8x32xbf16, #tpu.memory_space<vmem>>, vector<1x8x32xbf16>
    %26 = vector.shape_cast %25 : vector<1x8x32xbf16> to vector<8x32xbf16>
    %27 = vector.shape_cast %24 : vector<8x32xbf16> to vector<1x8x32xbf16>
    tpu.vector_store %arg10[%c0_19, %c0_20, %c0_21], %27 {strides = array<i32>} : memref<1x8x32xbf16, #tpu.memory_space<vmem>>, vector<1x8x32xbf16>,
    %28 = vector.extract_strided_slice %17 {offsets = [0, 64], sizes = [8, 32], strides = [1, 1]} : vector<8x96xf32> to vector<8x32xf32>
    %29 = arith.truncf %28 : vector<8x32xf32> to vector<8x32xbf16>
    %c0_22 = arith.constant 0 : index
    %c0_23 = arith.constant 0 : index
    %c0_24 = arith.constant 0 : index
    %30 = vector.load %arg11[%c0_22, %c0_23, %c0_24] : memref<1x8x32xbf16, #tpu.memory_space<vmem>>, vector<1x8x32xbf16>
    %31 = vector.shape_cast %30 : vector<1x8x32xbf16> to vector<8x32xbf16>
    %32 = vector.shape_cast %29 : vector<8x32xbf16> to vector<1x8x32xbf16>
    tpu.vector_store %arg11[%c0_22, %c0_23, %c0_24], %32 {strides = array<i32>} : memref<1x8x32xbf16, #tpu.memory_space<vmem>>, vector<1x8x32xbf16>,
    return
  }
  func.func @transform_0(%arg0: i32, %arg1: i32) -> (i32, i32, i32) {
    %c0_i32 = arith.constant 0 : i32
    %c0_i32_0 = arith.constant 0 : i32
    return %arg0, %arg1, %c0_i32 : i32, i32, i32
  }
  func.func @transform_1(%arg0: i32, %arg1: i32) -> (i32, i32) {
    %c0_i32 = arith.constant 0 : i32
    %c0_i32_0 = arith.constant 0 : i32
    %c0_i32_1 = arith.constant 0 : i32
    return %c0_i32, %c0_i32_0 : i32, i32
  }
  func.func @transform_2(%arg0: i32, %arg1: i32) -> (i32, i32) {
    %c0_i32 = arith.constant 0 : i32
    %c0_i32_0 = arith.constant 0 : i32
    %c0_i32_1 = arith.constant 0 : i32
    return %c0_i32, %c0_i32_0 : i32, i32
  }
  func.func @transform_3(%arg0: i32, %arg1: i32) -> (i32, i32) {
    %c0_i32 = arith.constant 0 : i32
    %c0_i32_0 = arith.constant 0 : i32
    return %arg1, %c0_i32 : i32, i32
  }
  func.func @transform_4(%arg0: i32, %arg1: i32) -> (i32, i32) {
    %c0_i32 = arith.constant 0 : i32
    %c0_i32_0 = arith.constant 0 : i32
    %c0_i32_1 = arith.constant 0 : i32
    return %c0_i32, %c0_i32_0 : i32, i32
  }
  func.func @transform_5(%arg0: i32, %arg1: i32) -> (i32, i32) {
    %c0_i32 = arith.constant 0 : i32
    %c0_i32_0 = arith.constant 0 : i32
    %c0_i32_1 = arith.constant 0 : i32
    return %c0_i32, %c0_i32_0 : i32, i32
  }
  func.func @transform_6(%arg0: i32, %arg1: i32) -> (i32, i32, i32) {
    %c0_i32 = arith.constant 0 : i32
    %c0_i32_0 = arith.constant 0 : i32
    return %arg0, %arg1, %c0_i32 : i32, i32, i32
  }
  func.func @transform_7(%arg0: i32, %arg1: i32) -> (i32, i32, i32) {
    %c0_i32 = arith.constant 0 : i32
    %c0_i32_0 = arith.constant 0 : i32
    return %arg0, %arg1, %c0_i32 : i32, i32, i32
  }
  func.func @transform_8(%arg0: i32, %arg1: i32) -> (i32, i32, i32) {
    %c0_i32 = arith.constant 0 : i32
    %c0_i32_0 = arith.constant 0 : i32
    return %arg0, %arg1, %c0_i32 : i32, i32, i32
  }
  func.func @transform_9(%arg0: i32, %arg1: i32) -> (i32, i32, i32) {
    %c0_i32 = arith.constant 0 : i32
    %c0_i32_0 = arith.constant 0 : i32
    return %arg0, %arg1, %c0_i32 : i32, i32, i32
  }
}

</mosaic_0001>

<bundles_post_ra>
// kernel: tpu_custom_call.1
= control target key start
LH: loop header
LB: loop body
LE: loop exit
PB: predicated region body
PF: predicated region fallthrough
CT: control target
= control target key end

     0   :  { %s1968_s0 = inlined_call_operand.hbm [shape: bf16[2,8,8], index: 0, kind: input, shape index: {}]   ;;  %s1969_s1 = inlined_call_operand.hbm [shape: bf16[8,32], index: 1, kind: input, shape index: {}]   ;;  %s1970_s2 = inlined_call_operand.hbm [shape: f32[1,32], index: 2, kind: input, shape index: {}]   ;;  %s1971_s3 = inlined_call_operand.hbm [shape: f32[8,32], index: 3, kind: input, shape index: {}]   ;;  %s1972_s4 = inlined_call_operand.hbm [shape: bf16[32,96], index: 4, kind: input, shape index: {}]   ;;  %s1973_s5 = inlined_call_operand.hbm [shape: f32[1,96], index: 5, kind: input, shape index: {}]   ;;  %s1974_s6 = inlined_call_operand.hbm [shape: f32[2,8,32], index: 6, kind: output, shape index: {0}]   ;;  %s1975_s7 = inlined_call_operand.hbm [shape: bf16[2,8,32], index: 7, kind: output, shape index: {1}]   ;;  %s1976_s8 = inlined_call_operand.hbm [shape: bf16[2,8,32], index: 8, kind: output, shape index: {2}]   ;;  %s1977_s9 = inlined_call_operand.hbm [shape: bf16[2,8,32], index: 9, kind: output, shape index: {3}]  }
   0x1   :  { %1984 = sst [smem:[#allocation26_spill]] %s1969_s1 }
   0x2   :  { %1985 = sst [smem:[#allocation27_spill]] %s1970_s2 }
   0x3   :  { %1986 = sst [smem:[#allocation28_spill]] %s1971_s3 }
   0x4   :  { %1987 = sst [smem:[#allocation29_spill]] %s1977_s9 }
   0x5   :  { %15 = vsyncpa [#allocation3], 0 }
   0x6   :  { %17 = vsyncpa [#allocation3 + $0x1], 0 }
   0x7   :  { %18 = vsyncpa [#allocation6], 0 }
   0x8   :  { %19 = vsyncpa [#allocation9], 0 }
   0x9   :  { %20 = vsyncpa [#allocation12], 0 }
   0xa   :  { %21 = vsyncpa [#allocation4], 0 }
   0xb   :  { %23 = vsyncpa [#allocation4 + $0x1], 0 }
   0xc   :  { %24 = vsyncpa [#allocation15], 0 }
   0xd   :  { %26 = vsyncpa [#allocation15 + $0x1], 0 }
   0xe   :  { %27 = vsyncpa [#allocation18], 0 }
   0xf   :  { %29 = vsyncpa [#allocation18 + $0x1], 0  ;;  %s1531_s30 = smov 0   ;;  %s1533_s10 = smov 0  }
  0x10   :  { %s1535_s11 = smov 0   ;;  %s1537_s12 = smov 0  }
  0x11   :  { %s1539_s13 = smov 0   ;;  %s1541_s14 = smov 0  }
  0x12 LB: > { %s1562_s15 = sadd.s32 4294967295, %s1463_s14   ;;  %p914_p0 = scmp.ge.s32.totalorder %s1463_s14, 1  ;;  %s1463_s14 = sphi %s1541_s14, %s35_s14   ;;  %s1459_s13 = sphi %s1539_s13, %s2018_s13   ;;  %s1455_s12 = sphi %s1537_s12, %s2017_s12   ;;  %s1451_s11 = sphi %s1535_s11, %s2016_s11   ;;  %s1447_s10 = sphi %s1533_s10, %s2015_s10   ;;  %s1443_s30 = sphi %s1531_s30, %s2014_s30  }
  0x13   : > { %p1978_p1 = scmp.eq.s32.totalorder %s1562_s15, 0  ;;  %p302_p2 = scmp.lt.s32.totalorder %s1463_s14, 3 }
  0x14   : > { %s1465_s17 = smov [#allocation5]   ;;  %s1466_s19 = smov [#allocation8]  }
  0x15   : > { %p1567_p3 = pnand %p914_p0, %p302_p2  ;;  %s315_s18 = sshll.u32 %s1465_s17, 4  ;;  %s316_s18 = int_to_ptr.vmem [resolvable:$true] %s315_s18 }
  0x16   : > { %s339_s20 = sshll.u32 %s1466_s19, 4  ;;  %s1467_s22 = smov [#allocation7]   ;;  %s1580_s20 = int_to_ptr.vmem [resolvable:$true] %s339_s20 }
  0x17   : > { %s1988_s16 = scalar_select %p1567_p3, 1, 0 }
  0x18   : > { %p1001_p5 = pneg %p1567_p3  ;;  %s326_s23 = sshll.u32 %s1467_s22, 4  ;;  %s1582_s23 = int_to_ptr.vmem [resolvable:$true] %s326_s23 }
  0x19   : > { %s1990_s1 = sld [smem:[#allocation26_spill]] }
  0x1a   : > { %p1576_p6 = pnand %p1001_p5, %p1978_p1 }
  0x1c   : > { %p1592_p8 = pneg %p1576_p6 }
  0x1f   : > { %s1107_s26 = scalar_lea.hbm %s1990_s1, 64 }
  0x20   : > { %p1108_p7 = scmp.ne.s32.totalorder %s1990_s1, %s1107_s26  ;;  %p1114_p11 = scmp.lt.u32.totalorder %s1107_s26, %s1990_s1 }
  0x22   : > { %p1110_p9 = pnand %p1592_p8, %p1108_p7 }
  0x24   : > { %p1111_p10 = pneg %p1110_p9 }
  0x26   : > { %p1116_p12 = pnand %p1114_p11, %p1111_p10 }
  0x28   : > { %1119 = shalt.err (!%p1116_p12)
}
  0x29   : > { %s1120_s22 = scalar_lea.vmem %s316_s18, 64  ;;  %p1128_p5 = scmp.lt.s32.totalorder %s316_s18, %s316_s18 }
  0x2a   : > { %p1121_p13 = scmp.ne.s32.totalorder %s316_s18, %s1120_s22  ;;  %p1129_p4 = scmp.lt.s32.totalorder %s1120_s22, %s1120_s22 }
  0x2c   : > { %p1123_p0 = pnand %p1121_p13, %p1592_p8  ;;  %p1130_p1 = por %p1129_p4, %p1128_p5 }
  0x2e   : > { %p1124_p2 = pneg %p1123_p0 }
  0x30   : > { %p1131_p3 = pnand %p1130_p1, %p1124_p2 }
  0x32   : > { %1134 = shalt.err (!%p1131_p3)
}
  0x33   : > { %1004 = dma.hbm_to_vmem [thread:$0]  (!%p1576_p6), %s1990_s1, 64, %s316_s18, [#allocation6]  }
  0x34   : > { %s1992_s3 = sld [smem:[#allocation28_spill]] }
  0x3a   : > { %s1135_s28 = scalar_lea.hbm %s1992_s3, 128 }
  0x3b   : > { %p1136_p7 = scmp.ne.s32.totalorder %s1992_s3, %s1135_s28  ;;  %p1142_p1 = scmp.lt.u32.totalorder %s1135_s28, %s1992_s3 }
  0x3d   : > { %p1138_p9 = pnand %p1136_p7, %p1592_p8 }
  0x3f   : > { %p1139_p4 = pneg %p1138_p9 }
  0x41   : > { %p1144_p3 = pnand %p1142_p1, %p1139_p4 }
  0x43   : > { %1147 = shalt.err (!%p1144_p3)
}
  0x44   : > { %s1148_s18 = scalar_lea.vmem %s1580_s20, 128  ;;  %p1156_p13 = scmp.lt.s32.totalorder %s1580_s20, %s1580_s20 }
  0x45   : > { %p1149_p10 = scmp.ne.s32.totalorder %s1580_s20, %s1148_s18  ;;  %p1157_p0 = scmp.lt.s32.totalorder %s1148_s18, %s1148_s18 }
  0x47   : > { %p1151_p11 = pnand %p1149_p10, %p1592_p8  ;;  %p1158_p2 = por %p1157_p0, %p1156_p13 }
  0x49   : > { %p1152_p12 = pneg %p1151_p11 }
  0x4b   : > { %p1159_p5 = pnand %p1158_p2, %p1152_p12 }
  0x4d   : > { %1162 = shalt.err (!%p1159_p5)
}
  0x4e   : > { %1010 = dma.hbm_to_vmem [thread:$0]  (!%p1576_p6), %s1992_s3, 128, %s1580_s20, [#allocation9]  }
  0x4f   : > { %s1993_s2 = sld [smem:[#allocation27_spill]] }
  0x55   : > { %s1163_s27 = scalar_lea.hbm %s1993_s2, 16 }
  0x56   : > { %p1164_p7 = scmp.ne.s32.totalorder %s1993_s2, %s1163_s27  ;;  %p1170_p1 = scmp.lt.u32.totalorder %s1163_s27, %s1993_s2 }
  0x58   : > { %p1166_p9 = pnand %p1164_p7, %p1592_p8 }
  0x5a   : > { %p1167_p4 = pneg %p1166_p9 }
  0x5c   : > { %p1172_p3 = pnand %p1170_p1, %p1167_p4 }
  0x5e   : > { %1175 = shalt.err (!%p1172_p3)
}
  0x5f   : > { %s1176_s20 = scalar_lea.vmem %s1582_s23, 16  ;;  %s1183_s18 = scalar_lea.vmem %s1582_s23, 32 }
  0x60   : > { %p1177_p10 = scmp.ne.s32.totalorder %s1582_s23, %s1176_s20  ;;  %p1184_p13 = scmp.lt.s32.totalorder %s1582_s23, %s1582_s23 }
  0x61   : > { %p1185_p0 = scmp.lt.s32.totalorder %s1183_s18, %s1176_s20 }
  0x62   : > { %p1179_p11 = pnand %p1177_p10, %p1592_p8 }
  0x63   : > { %p1186_p2 = por %p1185_p0, %p1184_p13 }
  0x64   : > { %p1180_p12 = pneg %p1179_p11 }
  0x66   : > { %p1187_p5 = pnand %p1186_p2, %p1180_p12 }
  0x68   : > { %1190 = shalt.err (!%p1187_p5)
}
  0x69   : > { %1007 = dma.hbm_to_vmem [thread:$0]  (!%p1576_p6), %s1993_s2, 16, %s1582_s23, [#allocation6]  }
  0x6a   : > { %s1468_s25 = smov [#allocation10]   ;;  %s1191_s17 = scalar_lea.hbm %s1972_s4, 256 }
  0x6b   : > { %s349_s26 = sshll.u32 %s1468_s25, 4  ;;  %p1192_p7 = scmp.ne.s32.totalorder %s1972_s4, %s1191_s17  ;;  %s350_s26 = int_to_ptr.vmem [resolvable:$true] %s349_s26 }
  0x6c   : > { %p1198_p1 = scmp.lt.u32.totalorder %s1191_s17, %s1972_s4 }
  0x6d   : > { %p1194_p9 = pnand %p1192_p7, %p1592_p8 }
  0x6f   : > { %p1195_p4 = pneg %p1194_p9 }
  0x71   : > { %p1200_p3 = pnand %p1198_p1, %p1195_p4 }
  0x73   : > { %1203 = shalt.err (!%p1200_p3)
}
  0x74   : > { %s1204_s23 = scalar_lea.vmem %s350_s26, 256  ;;  %p1212_p13 = scmp.lt.s32.totalorder %s350_s26, %s350_s26 }
  0x75   : > { %p1205_p10 = scmp.ne.s32.totalorder %s350_s26, %s1204_s23  ;;  %p1213_p0 = scmp.lt.s32.totalorder %s1204_s23, %s1204_s23 }
  0x77   : > { %p1207_p11 = pnand %p1205_p10, %p1592_p8  ;;  %p1214_p2 = por %p1213_p0, %p1212_p13 }
  0x79   : > { %p1208_p12 = pneg %p1207_p11 }
  0x7b   : > { %p1215_p5 = pnand %p1214_p2, %p1208_p12 }
  0x7d   : > { %1218 = shalt.err (!%p1215_p5)
}
  0x7e   : > { %s1469_s9 = smov 64   ;;  %s1470_s24 = smov 4  }
  0x7f   : > { %1013 = dma.hbm_to_vmem [thread:$0]  (!%p1576_p6), %s1972_s4, 256, %s350_s26, [#allocation9], %s1469_s9, %s1469_s9, %s1470_s24  }
  0x80   : > { %s1471_s28 = smov [#allocation11]   ;;  %s1219_s20 = scalar_lea.hbm %s1973_s5, 16 }
  0x81   : > { %s363_s17 = sshll.u32 %s1471_s28, 4  ;;  %p1220_p7 = scmp.ne.s32.totalorder %s1973_s5, %s1219_s20  ;;  %s364_s17 = int_to_ptr.vmem [resolvable:$true] %s363_s17 }
  0x82   : > { %p1226_p1 = scmp.lt.u32.totalorder %s1219_s20, %s1973_s5 }
  0x83   : > { %p1222_p9 = pnand %p1220_p7, %p1592_p8 }
  0x85   : > { %p1223_p4 = pneg %p1222_p9 }
  0x87   : > { %p1228_p3 = pnand %p1226_p1, %p1223_p4 }
  0x89   : > { %1231 = shalt.err (!%p1228_p3)
}
  0x8a   : > { %s1232_s26 = scalar_lea.vmem %s364_s17, 16  ;;  %s1239_s9 = scalar_lea.vmem %s364_s17, 32 }
  0x8b   : > { %p1233_p10 = scmp.ne.s32.totalorder %s364_s17, %s1232_s26  ;;  %p1240_p13 = scmp.lt.s32.totalorder %s364_s17, %s364_s17 }
  0x8c   : > { %p1241_p0 = scmp.lt.s32.totalorder %s1239_s9, %s1232_s26 }
  0x8d   : > { %p1235_p11 = pnand %p1233_p10, %p1592_p8 }
  0x8e   : > { %p1242_p2 = por %p1241_p0, %p1240_p13 }
  0x8f   : > { %p1236_p12 = pneg %p1235_p11 }
  0x91   : > { %p1243_p5 = pnand %p1242_p2, %p1236_p12 }
  0x93   : > { %1246 = shalt.err (!%p1243_p5)
}
  0x94   : > { %1016 = dma.hbm_to_vmem [thread:$0]  (!%p1576_p6), %s1973_s5, 16, %s364_s17, [#allocation12]  }
  0x95   : > { %s1981_s1 = sadd.s32 4294967294, %s1463_s14   ;;  %s47_s2 = sadd.s32 1, %s1459_s13 }
  0x96   : > { %s56_s21 = sadd.s32 1, %s1451_s11  ;;  %p49_p8 = scmp.ge.s32.totalorder %s47_s2, 2 }
  0x97   : > { %p63_p7 = scmp.ne.s32.totalorder %s1451_s11, %s1447_s10  ;;  %p64_p9 = scmp.eq.s32.totalorder %s1463_s14, 0 }
  0x98   : > { %p69_p4 = scmp.ne.s32.totalorder %s1447_s10, %s1443_s30  ;;  %s2020_s2 = smov (%p49_p8, %s47_s2), 0 }
  0x99   : > { %p1701_p1 = por %p64_p9, %p63_p7  ;;  %p1995_p3 = scmp.eq.s32.totalorder %s1562_s15, 0 }
  0x9a   : > { %s51_s28 = ssub.s32 %s1459_s13, %s2020_s2  ;;  %p205_p10 = scmp.eq.s32.totalorder %s1562_s15, 1 }
  0x9b   : > { %p1707_p6 = por %p1995_p3, %p69_p4  ;;  %p54_p11 = scmp.eq.s32.totalorder %s51_s28, 0 }
  0x9c   : > { %p211_p12 = scmp.eq.s32.totalorder %s1981_s1, 1  ;;  %p1716_p13 = por %p205_p10, %p63_p7 }
  0x9d   : > { %p1039_p0 = scmp.lt.s32.totalorder %s1463_s14, 2  ;;  %s374_s20 = sand.u32 1, %s1451_s11  }
  0x9e   : > { %s1997_s17 = scalar_select %p1716_p13, 1, 0 }
  0x9f   : > { %s1722_s19 = scalar_select %p54_p11, %s1451_s11, %s56_s21  }
  0xa0   : > { %p1724_p2 = por %p211_p12, %p69_p4  ;;  %s921_s18 = sshll.u32 %s374_s20, 2 }
  0xa1   : > { %s922_s23 = sshll.u32 %s1459_s13, 6  ;;  %s378_s25 = scalar_lea.vmem [#allocation2], %s921_s18 }
  0xa2   : > { %s1998_s22 = scalar_select %p1724_p2, 1, 0 }
  0xa3   : > { %s1733_s24 = scalar_lea.hbm %s1968_s0, %s922_s23  ;;  %s386_s28 = sshll.u32 %s378_s25, 4  ;;  %s1735_s28 = int_to_ptr.vmem [resolvable:$true] %s386_s28 }
  0xa4   : > { %p1739_p5 = pnand %p1039_p0, %p1701_p1  ;;  %s375_s1 = scalar_lea.sflag [#allocation3], %s374_s20 }
  0xa5   : > { %s1247_s3 = scalar_lea.hbm %s1733_s24, 64  ;;  %s1252_s26 = scalar_lea.hbm %s1968_s0, 128 }
  0xa6   : > { %p1248_p8 = scmp.ne.s32.totalorder %s1733_s24, %s1247_s3  ;;  %p1249_p7 = pneg %p1739_p5 }
  0xa7   : > { %p1253_p1 = scmp.lt.u32.totalorder %s1733_s24, %s1968_s0  ;;  %p1254_p3 = scmp.lt.u32.totalorder %s1252_s26, %s1247_s3 }
  0xa8   : > { %p1250_p9 = pnand %p1249_p7, %p1248_p8  ;;  %p1256_p11 = scmp.lt.u32.totalorder %s1247_s3, %s1733_s24 }
  0xa9   : > { %p1255_p10 = por %p1254_p3, %p1253_p1 }
  0xaa   : > { %p1251_p4 = pneg %p1250_p9 }
  0xab   : > { %p1257_p12 = por %p1256_p11, %p1255_p10 }
  0xad   : > { %p1258_p0 = pnand %p1257_p12, %p1251_p4 }
  0xaf   : > { %1261 = shalt.err (!%p1258_p0)
}
  0xb0   : > { %s1262_s20 = scalar_lea.vmem %s1735_s28, 64  ;;  %s1472_s25 = smov [#allocation2]  }
  0xb1   : > { %p1263_p8 = scmp.ne.s32.totalorder %s1735_s28, %s1262_s20  ;;  %s1267_s18 = sshll.u32 %s1472_s25, 4  ;;  %s1268_s18 = int_to_ptr.vmem [resolvable:$false] %s1267_s18 }
  0xb2   : > { %s1269_s23 = scalar_lea.vmem %s1268_s18, 128  ;;  %p1270_p13 = scmp.lt.s32.totalorder %s1735_s28, %s1268_s18 }
  0xb3   : > { %p1265_p9 = pnand %p1263_p8, %p1249_p7  ;;  %p1271_p1 = scmp.lt.s32.totalorder %s1269_s23, %s1262_s20 }
  0xb5   : > { %p1266_p2 = pneg %p1265_p9  ;;  %p1272_p3 = por %p1271_p1, %p1270_p13 }
  0xb7   : > { %p1273_p10 = pnand %p1272_p3, %p1266_p2 }
  0xb9   : > { %1276 = shalt.err (!%p1273_p10)
}
  0xba   : > { %1020 = dma.hbm_to_vmem [thread:$0]  (!%p1739_p5), %s1733_s24, 64, %s1735_s28, %s375_s1  }
  0xbb   : > { %p2000_p4 = scmp.ne.s32.totalorder %s1988_s16, 0 }
  0xbc   : > { %s1771_s3 = sand.u32 (!%p2000_p4), 1, %s1447_s10  }
  0xbd   : > { %395 = sbr.rel (%p2000_p4) target bundleno = 815 (0x32f), region = 44  ;;  %s1774_s26 = sshll.u32 (!%p2000_p4), %s1771_s3, 2 }
  0xbe   : > { %s398_s29 = scalar_lea.sflag (!%p2000_p4), [#allocation3], %s1771_s3  ;;  %s401_s9 = scalar_lea.vmem (!%p2000_p4), [#allocation2], %s1774_s26 }
  0xc4   : > { %1414 = dma.done.wait (%p1707_p6), %s398_s29, 64  }
  0xc5   : > { %1416 = vsyncadd (%p1707_p6), %s398_s29, 4294967232  ;;  %p2001_p13 = scmp.eq.s32.totalorder %s1562_s15, 0 }
  0xc7   : > { %1418 = dma.done.wait (%p2001_p13), [#allocation6], 80   ;;  %p2002_p2 = pmov %p2001_p13 }
  0xc9   : > { %1420 = vsyncadd (%p2002_p2), [#allocation6], 4294967216  ;;  %p2003_p5 = pmov %p2002_p2 }
  0xca   : > { %p2004_p7 = pmov %p2002_p2 }
  0xcb   : > { %1422 = dma.done.wait (%p2003_p5), [#allocation9], 384  }
  0xcc   : > { %1424 = vsyncadd (%p2004_p7), [#allocation9], 4294966912  ;;  %p2005_p11 = pmov %p2002_p2 }
  0xcd   : > { %p2006_p12 = pmov %p2002_p2 }
  0xce   : > { %1426 = dma.done.wait (%p2005_p11), [#allocation12], 16  }
  0xcf   : > { %1428 = vsyncadd (%p2006_p12), [#allocation12], 4294967280  ;;  %v1473_v0 = vmov 0.0   ;;  %vm1474_vm0 = vmmov 0   ;;  %vm485_vm1 = vcmask 1043456   ;;  %vm481_vm2 = vcmask 64512  }
  0xd0   : > { %957 = vmatprep.subr.bf16.mxu0 %v1473_v0  ;;  %959 = vmatprep.mubr.msk.bf16.mxu0 %vm1474_vm0, %v1473_v0  ;;  %v473_v1 = vld [vmem:[#allocation5] sm:$0xf]  ;;  %v472_v3 = vld [vmem:[%s401_s9] sm:$0xf]  ;;  %v1105_v4 = vld [vmem:[#allocation10] sm:$0xff]   ;;  %s930_s16 = sshll.u32 %s1771_s3, 3 }
  0xd1   : > { %963 = vmatprep.subr.bf16.mxu1 %v1473_v0  ;;  %967 = vmatprep.mubr.msk.bf16.mxu1 %vm1474_vm0, %v1473_v0  ;;  %v487_v2 = vsel %vm485_vm1, %v473_v1, 0  ;;  %v1106_v5 = vld [vmem:[#allocation10 + $0x8] sm:$0xff]   ;;  %v934_v6 = vld [vmem:[#allocation7] ss:$0 sm:$0xff]  ;;  %v529_v8 = vld [vmem:[#allocation8] sm:$0xff]  ;;  %vm531_vm3 = vcmask 261120  }
  0xd2   : > { %958 = vmatpush3.bf16.msra.mxu0 %v487_v2  ;;  %964 = vmatpush3.bf16.msra.mxu1 %v1105_v4  ;;  %s449_s1 = scalar_lea.vmem [#allocation13], %s930_s16  ;;  %s1797_s24 = sshll.u32 %s1455_s12, 6  ;;  %v936_v15 = vld [vmem:[#allocation11] ss:$0 sm:$0xff] }
  0xd3   : > { %965 = vmatprep.subr.bf16.mxu1 %v1473_v0  ;;  %s945_s28 = sshll.u32 %s1455_s12, 7  ;;  %s644_s18 = sshll.u32 %s449_s1, 4  ;;  %s1810_s18 = int_to_ptr.vmem [resolvable:$true] %s644_s18 }
  0xd4   : > { %s1803_s25 = scalar_lea.hbm %s1974_s6, %s945_s28  ;;  %s1983_s23 = scalar_lea.vmem [#allocation14], %s1774_s26 }
  0xd5   : > { %960 = vmatmul.mubr.msk.bf16.vlgmr.msra.gmra.mrb[0].mxu0 %vm481_vm2, %v472_v3  ;;  %s1808_s29 = sshll.u32 %s1983_s23, 4  ;;  %s615_s9 = scalar_lea.sflag [#allocation4], %s1771_s3  ;;  %s1841_s29 = int_to_ptr.vmem [resolvable:$true] %s1808_s29 }
  0xd6   : > { %966 = vmatpush3.bf16.msra.mxu1 %v1106_v5  ;;  %s1277_s16 = scalar_lea.vmem %s1810_s18, 128  ;;  %p2007_p0 = scmp.ne.s32.totalorder %s1997_s17, 0 }
  0xd7   : > { %p1278_p6 = scmp.ne.s32.totalorder %s1810_s18, %s1277_s16  ;;  %s1475_s12 = smov [#allocation13]  }
  0xd8   : > { %s1281_s28 = sshll.u32 %s1475_s12, 4  ;;  %s1282_s28 = int_to_ptr.vmem [resolvable:$false] %s1281_s28 }
  0xd9   : > { %p1279_p8 = pnand %p1278_p6, %p2007_p0  ;;  %p1284_p1 = scmp.lt.s32.totalorder %s1810_s18, %s1282_s28 }
  0xdb   : > { %p1280_p9 = pneg %p1279_p8 }
 0x1a8   : > { %v523_v7 = vpop.f32.mrb[0].mxu0 }
 0x1a9   : > { %v524_v9 = vadd.f32 %v934_v6, %v523_v7  ;;  %v961_v10 = vpop.f32.mrb[1].mxu0 }
 0x1aa   : > { %v526_v11 = vpop.f32.mrb[2].mxu0 }
 0x1ab   : > { %v530_v12 = vadd.f32 %v529_v8, %v524_v9  ;;  %v962_v13 = vpop.f32.mrb[3].mxu0 }
 0x1ad   : > { %v533_v14 = vpack.c.bf16 %v530_v12, %v530_v12  ;;  %532 = vst.msk [vmem:[%s449_s1] sm:$0xff] %vm531_vm3, %v530_v12  ;;  %s1283_s1 = scalar_lea.vmem %s1282_s28, 256 }
 0x1ae   : > { %p1285_p3 = scmp.lt.s32.totalorder %s1283_s1, %s1277_s16 }
 0x1af   : > { %968 = vmatmul.mubr.msk.bf16.vlgmr.msra.gmra.mrb[0].mxu1 %vm531_vm3, %v533_v14 }
 0x1b0   : > { %p1286_p10 = por %p1285_p3, %p1284_p1 }
 0x1b2   : > { %p1287_p4 = pnand %p1286_p10, %p1280_p9 }
 0x282   : > { %v594_v16 = vpop.f32.mrb[0].mxu1 }
 0x283   : > { %1290 = shalt.err (!%p1287_p4)
}
 0x284   : > { %s1291_s21 = scalar_lea.hbm %s1803_s25, 128  ;;  %s1295_s12 = scalar_lea.hbm %s1974_s6, 256 }
 0x285   : > { %p1292_p13 = scmp.ne.s32.totalorder %s1803_s25, %s1291_s21  ;;  %p1296_p7 = scmp.lt.u32.totalorder %s1803_s25, %s1974_s6 }
 0x286   : > { %p1297_p11 = scmp.lt.u32.totalorder %s1295_s12, %s1291_s21  ;;  %p1299_p6 = scmp.lt.u32.totalorder %s1291_s21, %s1803_s25 }
 0x287   : > { %p1293_p2 = pnand %p1292_p13, %p2007_p0 }
 0x288   : > { %p1298_p12 = por %p1297_p11, %p1296_p7 }
 0x289   : > { %p1294_p5 = pneg %p1293_p2 }
 0x28a   : > { %p1300_p8 = por %p1299_p6, %p1298_p12 }
 0x28c   : > { %p1301_p9 = pnand %p1300_p8, %p1294_p5 }
 0x28e   : > { %1304 = shalt.err (!%p1301_p9)
}
 0x28f   : > { %993 = dma.vmem_to_hbm [thread:$0]  (%p2007_p0), %s1810_s18, 128, %s1803_s25, %s615_s9   ;;  %v595_v17 = vadd.f32 %v936_v15, %v594_v16  ;;  %v969_v18 = vpop.f32.mrb[1].mxu1  ;;  %vm601_vm4 = vcmask 257024  }
 0x290   : > { %v597_v19 = vpop.f32.mrb[2].mxu1  ;;  %s1838_s16 = scalar_lea.hbm %s1975_s7, %s1797_s24  ;;  %s1476_s1 = smov 96  }
 0x291   : > { %v600_v20 = vpack.c.bf16 %v595_v17, %v595_v17  ;;  %v970_v21 = vpop.f32.mrb[3].mxu1  ;;  %s2008_s25 = scalar_lea.vmem [#allocation14], %s1774_s26  ;;  %s2009_s18 = sand.u32 1, %s1562_s15  }
 0x292   : > { %s1848_s9 = scalar_lea.sflag [#allocation15], %s2009_s18  ;;  %s1305_s21 = scalar_lea.vmem %s1841_s29, 64 }
 0x293   : > { %606 = vrot.lane.b32.xlu0 %v600_v20, %s1476_s1  ;;  %602 = vst.msk [vmem:[%s2008_s25] sm:$0xf] %vm601_vm4, %v600_v20  ;;  %p1306_p1 = scmp.ne.s32.totalorder %s1841_s29, %s1305_s21  ;;  %s1477_s20 = smov [#allocation14]  }
 0x294   : > { %s1309_s12 = sshll.u32 %s1477_s20, 4  ;;  %s1310_s12 = int_to_ptr.vmem [resolvable:$false] %s1309_s12 }
 0x295   : > { %p1307_p3 = pnand %p1306_p1, %p2007_p0  ;;  %s1311_s28 = scalar_lea.vmem %s1310_s12, 128 }
 0x296   : > { %p1312_p4 = scmp.lt.s32.totalorder %s1841_s29, %s1310_s12  ;;  %p1313_p13 = scmp.lt.s32.totalorder %s1311_s28, %s1305_s21 }
 0x297   : > { %p1308_p10 = pneg %p1307_p3 }
 0x298   : > { %p1314_p2 = por %p1313_p13, %p1312_p4 }
 0x29a   : > { %p1315_p5 = pnand %p1314_p2, %p1308_p10 }
 0x29c   : > { %1318 = shalt.err (!%p1315_p5)
}
 0x29d   : > { %s1319_s15 = scalar_lea.hbm %s1838_s16, 64  ;;  %s1323_s1 = scalar_lea.hbm %s1975_s7, 128 }
 0x29e   : > { %p1320_p7 = scmp.ne.s32.totalorder %s1838_s16, %s1319_s15  ;;  %p1324_p6 = scmp.lt.u32.totalorder %s1838_s16, %s1975_s7 }
 0x29f   : > { %p1325_p8 = scmp.lt.u32.totalorder %s1323_s1, %s1319_s15  ;;  %p1327_p1 = scmp.lt.u32.totalorder %s1319_s15, %s1838_s16 }
 0x2a0   : > { %p1321_p11 = pnand %p1320_p7, %p2007_p0 }
 0x2a1   : > { %p1326_p9 = por %p1325_p8, %p1324_p6 }
 0x2a2   : > { %p1322_p12 = pneg %p1321_p11 }
 0x2a3   : > { %p1328_p3 = por %p1327_p1, %p1326_p9 }
 0x2a5   : > { %p1329_p10 = pnand %p1328_p3, %p1322_p12 }
 0x2a7   : > { %1332 = shalt.err (!%p1329_p10)
}
 0x2a8   : > { %994 = dma.vmem_to_hbm [thread:$0]  (%p2007_p0), %s1841_s29, 64, %s1838_s16, %s1848_s9  }
 0x2a9   : > { %s1478_s21 = smov 64   ;;  %s463_s20 = scalar_lea.vmem [#allocation16], %s1774_s26 }
 0x2aa   : > { %610 = vrot.lane.b32.xlu0 %v600_v20, %s1478_s21  ;;  %s672_s12 = sshll.u32 %s463_s20, 4  ;;  %s1877_s27 = scalar_lea.hbm %s1976_s8, %s1797_s24  ;;  %s1879_s12 = int_to_ptr.vmem [resolvable:$true] %s672_s12 }
 0x2ab   : > { %s470_s23 = scalar_lea.vmem [#allocation17], %s1774_s26  ;;  %s1333_s29 = scalar_lea.vmem %s1879_s12, 64 }
 0x2ac   : > { %s1884_s1 = sshll.u32 %s470_s23, 4  ;;  %p1334_p4 = scmp.ne.s32.totalorder %s1879_s12, %s1333_s29  ;;  %s1916_s1 = int_to_ptr.vmem [resolvable:$true] %s1884_s1 }
 0x2ad   : > { %s1479_s16 = smov [#allocation16]  }
 0x2ae   : > { %p1335_p13 = pnand %p1334_p4, %p2007_p0  ;;  %s1337_s25 = sshll.u32 %s1479_s16, 4  ;;  %s1338_s25 = int_to_ptr.vmem [resolvable:$false] %s1337_s25 }
 0x2af   : > { %s1339_s18 = scalar_lea.vmem %s1338_s25, 128  ;;  %p1340_p5 = scmp.lt.s32.totalorder %s1879_s12, %s1338_s25 }
 0x2b0   : > { %p1336_p2 = pneg %p1335_p13  ;;  %p1341_p7 = scmp.lt.s32.totalorder %s1339_s18, %s1333_s29 }
 0x2b2   : > { %p1342_p11 = por %p1341_p7, %p1340_p5 }
 0x2b4   : > { %p1343_p12 = pnand %p1342_p11, %p1336_p2 }
 0x305   : > { %v607_v22 = vpop.permute.xlu0 %606 }
 0x306   : > { %609 = vst.msk [vmem:[%s463_s20] sm:$0xf] %vm601_vm4, %v607_v22 }
 0x307   : > { %1346 = shalt.err (!%p1343_p12)
}
 0x308   : > { %s1347_s21 = scalar_lea.hbm %s1877_s27, 64  ;;  %s1351_s15 = scalar_lea.hbm %s1976_s8, 128 }
 0x309   : > { %p1348_p6 = scmp.ne.s32.totalorder %s1877_s27, %s1347_s21  ;;  %p1352_p1 = scmp.lt.u32.totalorder %s1877_s27, %s1976_s8 }
 0x30a   : > { %p1353_p3 = scmp.lt.u32.totalorder %s1351_s15, %s1347_s21  ;;  %p1355_p4 = scmp.lt.u32.totalorder %s1347_s21, %s1877_s27 }
 0x30b   : > { %p1349_p8 = pnand %p1348_p6, %p2007_p0 }
 0x30c   : > { %p1354_p10 = por %p1353_p3, %p1352_p1 }
 0x30d   : > { %p1350_p9 = pneg %p1349_p8 }
 0x30e   : > { %p1356_p13 = por %p1355_p4, %p1354_p10 }
 0x310   : > { %p1357_p2 = pnand %p1356_p13, %p1350_p9 }
 0x312   : > { %1360 = shalt.err (!%p1357_p2)
}
 0x313   : > { %995 = dma.vmem_to_hbm [thread:$0]  (%p2007_p0), %s1879_s12, 64, %s1877_s27, %s1848_s9  }
 0x314   : > { %s2010_s20 = sld [smem:[#allocation29_spill]]  ;;  %s630_s21 = scalar_lea.sflag [#allocation18], %s1771_s3 }
 0x315   : > { %s1361_s15 = scalar_lea.vmem %s1916_s1, 64  ;;  %s1480_s9 = smov [#allocation17]  }
 0x316   : > { %p1362_p5 = scmp.ne.s32.totalorder %s1916_s1, %s1361_s15  ;;  %s1365_s12 = sshll.u32 %s1480_s9, 4  ;;  %s1366_s12 = int_to_ptr.vmem [resolvable:$false] %s1365_s12 }
 0x317   : > { %p1368_p12 = scmp.lt.s32.totalorder %s1916_s1, %s1366_s12 }
 0x318   : > { %p1363_p7 = pnand %p1362_p5, %p2007_p0 }
 0x31a   : > { %s1913_s28 = scalar_lea.hbm %s2010_s20, %s1797_s24  ;;  %p1364_p11 = pneg %p1363_p7 }
 0x31b   : > { %s1367_s24 = scalar_lea.vmem %s1366_s12, 128 }
 0x31c   : > { %v611_v23 = vpop.permute.xlu0 %610  ;;  %p1369_p6 = scmp.lt.s32.totalorder %s1367_s24, %s1361_s15 }
 0x31d   : > { %613 = vst.msk [vmem:[%s470_s23] sm:$0xf] %vm601_vm4, %v611_v23 }
 0x31e   : > { %p1370_p8 = por %p1369_p6, %p1368_p12 }
 0x320   : > { %p1371_p9 = pnand %p1370_p8, %p1364_p11 }
 0x322   : > { %1374 = shalt.err (!%p1371_p9)
}
 0x323   : > { %s1375_s3 = scalar_lea.hbm %s1913_s28, 64  ;;  %s1379_s23 = scalar_lea.hbm %s2010_s20, 128 }
 0x324   : > { %p1376_p1 = scmp.ne.s32.totalorder %s1913_s28, %s1375_s3  ;;  %p1380_p4 = scmp.lt.u32.totalorder %s1913_s28, %s2010_s20 }
 0x325   : > { %p1381_p13 = scmp.lt.u32.totalorder %s1379_s23, %s1375_s3  ;;  %p1383_p5 = scmp.lt.u32.totalorder %s1375_s3, %s1913_s28 }
 0x326   : > { %p1377_p3 = pnand %p1376_p1, %p2007_p0 }
 0x327   : > { %p1382_p2 = por %p1381_p13, %p1380_p4 }
 0x328   : > { %p1378_p10 = pneg %p1377_p3 }
 0x329   : > { %p1384_p7 = por %p1383_p5, %p1382_p2 }
 0x32b   : > { %p1385_p11 = pnand %p1384_p7, %p1378_p10 }
 0x32d   : > { %1388 = shalt.err (!%p1385_p11)
}
 0x32e   : > { %996 = dma.vmem_to_hbm [thread:$0]  (%p2007_p0), %s1916_s1, 64, %s1913_s28, %s630_s21  }
 0x32f PF: > { %s698_s29 = sand.u32 1, %s1443_s30   ;;  %p2011_p12 = scmp.ne.s32.totalorder %s1998_s22, 0 }
 0x330   : > { %p2012_p6 = scmp.ge.s32.totalorder %s1463_s14, 2  ;;  %s699_s18 = scalar_lea.sflag [#allocation4], %s698_s29 }
 0x332   : > { %p1022_p8 = pnand %p2012_p6, %p2011_p12 }
 0x334   : > { %1430 = dma.done.wait (!%p1022_p8), %s699_s18, 128  }
 0x335   : > { %1432 = vsyncadd (!%p1022_p8), %s699_s18, 4294967168  ;;  %s2013_s15 = sadd.s32 4294967294, %s1463_s14  }
 0x336   : > { %s707_s9 = sand.u32 1, %s2013_s15  }
 0x337   : > { %s708_s12 = scalar_lea.sflag [#allocation15], %s707_s9 }
 0x338   : > { %1434 = dma.done.wait (!%p1022_p8), %s708_s12, 128  }
 0x339   : > { %1436 = vsyncadd (!%p1022_p8), %s708_s12, 4294967168  ;;  %s726_s17 = scalar_lea.sflag [#allocation18], %s698_s29 }
 0x33a   : > { %1438 = dma.done.wait (!%p1022_p8), %s726_s17, 64  }
 0x33b   : > { %1440 = vsyncadd (!%p1022_p8), %s726_s17, 4294967232  ;;  %s35_s14 = sadd.s32 1, %s1463_s14   ;;  %s2014_s30 = smov %s1447_s10 }
 0x33c   : > { %p32_p0 = scmp.ge.s32.totalorder %s35_s14, 4   ;;  %s2015_s10 = smov %s1451_s11 }
 0x33d   : > { %s2016_s11 = smov %s1722_s19  ;;  %s2017_s12 = smov %s1459_s13 }
 0x33e   : > { %s2018_s13 = smov %s2020_s2  ;;  %34 = sbr.rel (!%p32_p0) target bundleno = 18 (0x12), region = 159 }
 0x345   :  { %731 = vsyncpa [#allocation3], 1 }
 0x346   :  { %733 = vsyncpa [#allocation3 + $0x1], 1 }
 0x347   :  { %734 = vsyncpa [#allocation6], 1 }
 0x348   :  { %735 = vsyncpa [#allocation9], 1 }
 0x349   :  { %736 = vsyncpa [#allocation12], 1 }
 0x34a   :  { %737 = vsyncpa [#allocation4], 1 }
 0x34b   :  { %739 = vsyncpa [#allocation4 + $0x1], 1 }
 0x34c   :  { %740 = vsyncpa [#allocation15], 1 }
 0x34d   :  { %742 = vsyncpa [#allocation15 + $0x1], 1 }
 0x34e   :  { %743 = vsyncpa [#allocation18], 1 }
 0x34f   :  { %745 = vsyncpa [#allocation18 + $0x1], 1 }

</bundles_post_ra>
